<compile_context>
chip_gen: v7x
topology: tpu7x:2x2x1
jax: 0.10.0
libtpu: 0.0.40
codegen_flags: <defaults>
</compile_context>

<pallas_src>
import math

import jax
import jax.numpy as jnp
from jax import lax
from jax.experimental import pallas as pl
from jax.experimental.pallas import tpu as pltpu


def _mlp_kernel(x_ref, w1_ref, b1_ref, w2_ref, b2_ref, o_ref):
    # layer1 (transposed): contract W1 (H, F) with x (TB, F) over F -> (H, TB).
    # Batch lands in the lane dimension; MXU handles the transposed contraction.
    h = lax.dot_general(
        w1_ref[...], x_ref[...],
        dimension_numbers=(((1,), (1,)), ((), ())),
        preferred_element_type=jnp.float32,
    )
    # b1 is a (H, 1) column, broadcast across the batch lanes.
    h = jnp.maximum(h + b1_ref[...], 0.0)

    # layer2 (out_features == 1): elementwise multiply with the (H, 1) w2
    # column and reduce over the H sublanes (VPU + XLU slots, off the MXU),
    # producing a lane-dense (1, TB) row.
    z = jnp.sum(h * w2_ref[...], axis=0, keepdims=True) + b2_ref[0]

    o_ref[...] = jax.nn.sigmoid(z).astype(o_ref.dtype)


def two_layer_net(x, w1, b1, w2, b2):
    """Forward pass matching the PyTorch TwoLayerNet.

    Args:
      x:  (B, F) float32
      w1: (H, F) float32   (nn.Linear convention: out_features x in_features)
      b1: (H,)   float32
      w2: (1, H) float32
      b2: (1,)   float32
    Returns:
      (B, 1) float32
    """
    B, F = x.shape
    H = w1.shape[0]

    # Batch tile: full batch if small, otherwise 512 rows (multiple of 128 so
    # the lane-dense (1, TILE_B) output tile satisfies the (8,128) rule and
    # stores are unmasked; large tiles amortize per-step overhead).
    # TODO(synk): for very large F*H (weights approaching VMEM capacity, e.g.
    # tens of MiB of f32 on v7x's 64 MiB VMEM) add a grid axis over H instead
    # of keeping W1 fully resident.
    TILE_B = B if B <= 512 else 512

    b1c = b1.reshape(H, 1)   # column: broadcasts over batch lanes in-kernel
    w2c = w2.reshape(H, 1)   # column: multiplied into h_T, reduced over H
    b2r = b2.reshape(1)      # scalar, placed in SMEM

    grid = (pl.cdiv(B, TILE_B),)

    out_t = pl.pallas_call(
        _mlp_kernel,
        out_shape=jax.ShapeDtypeStruct((1, B), jnp.float32),
        grid=grid,
        in_specs=[
            pl.BlockSpec((TILE_B, F), lambda i: (i, 0)),          # x: tiled over batch
            pl.BlockSpec((H, F), lambda i: (0, 0)),               # W1: resident
            pl.BlockSpec((H, 1), lambda i: (0, 0)),               # b1 column: resident
            pl.BlockSpec((H, 1), lambda i: (0, 0)),               # w2 column: resident
            pl.BlockSpec(memory_space=pltpu.MemorySpace.SMEM),    # b2: scalar in SMEM
        ],
        out_specs=pl.BlockSpec((1, TILE_B), lambda i: (0, i)),    # lane-dense output
        compiler_params=pltpu.CompilerParams(
            dimension_semantics=("parallel",),
        ),
    )(x, w1, b1c, w2c, b2r)

    # (1, B) -> (B, 1): contiguous reshape, zero-cost layout plumbing.
    return out_t.reshape(B, 1)


def _xavier_uniform(key, shape):
    # Matches torch.nn.init.xavier_uniform_: U(-a, a), a = sqrt(6/(fan_in+fan_out))
    fan_out, fan_in = shape
    bound = math.sqrt(6.0 / (fan_in + fan_out))
    return jax.random.uniform(key, shape, jnp.float32, -bound, bound)


def _linear_bias_init(key, fan_in, shape):
    # Matches torch default bias init: U(-1/sqrt(fan_in), 1/sqrt(fan_in))
    bound = 1.0 / math.sqrt(fan_in)
    return jax.random.uniform(key, shape, jnp.float32, -bound, bound)


if __name__ == "__main__":
    batch = 8
    input_size = 16
    hidden_size = 8

    key = jax.random.PRNGKey(0)
    k_x, k_w1, k_b1, k_w2, k_b2 = jax.random.split(key, 5)

    x = jax.random.normal(k_x, (batch, input_size), jnp.float32)
    w1 = _xavier_uniform(k_w1, (hidden_size, input_size))
    b1 = _linear_bias_init(k_b1, input_size, (hidden_size,))
    w2 = _xavier_uniform(k_w2, (1, hidden_size))
    b2 = _linear_bias_init(k_b2, hidden_size, (1,))

    out = two_layer_net(x, w1, b1, w2, b2)
    out = jax.block_until_ready(out)

    # Pure-JAX reference check.
    h_ref = jnp.maximum(x @ w1.T + b1, 0.0)
    y_ref = jax.nn.sigmoid(h_ref @ w2.T + b2)
    assert out.shape == (batch, 1)
    assert jnp.allclose(out, y_ref, atol=1e-5), "mismatch vs reference"

    print("KERNEL_OK")
</pallas_src>

<mosaic_0001>
module attributes {stable_mosaic.version = 11 : i64} {
  func.func @_mlp_kernel(%arg0: i32, %arg1: memref<8x16xf32, #tpu.memory_space<vmem>>, %arg2: memref<8x16xf32, #tpu.memory_space<vmem>>, %arg3: memref<8x1xf32, #tpu.memory_space<vmem>>, %arg4: memref<8x1xf32, #tpu.memory_space<vmem>>, %arg5: memref<1xf32, #tpu.memory_space<smem>>, %arg6: memref<1x8xf32, #tpu.memory_space<vmem>>) attributes {dimension_semantics = [#tpu.dimension_semantics<parallel>], iteration_bounds = array<i64: 1>, scalar_prefetch = 0 : i64, scratch_operands = 0 : i64, tpu.core_type = #tpu.core_type<tc>, window_params = [{transform_indices = @transform_0, window_bounds = array<i64: 8, 16>}, {pipeline_mode = #tpu.pipeline_mode<synchronous>, transform_indices = @transform_1, window_bounds = array<i64: 8, 16>}, {pipeline_mode = #tpu.pipeline_mode<synchronous>, transform_indices = @transform_2, window_bounds = array<i64: 8, 1>}, {pipeline_mode = #tpu.pipeline_mode<synchronous>, transform_indices = @transform_3, window_bounds = array<i64: 8, 1>}, {transform_indices = @transform_4, window_bounds = array<i64: 1>}, {transform_indices = @transform_5, window_bounds = array<i64: 1, 8>}]} {
    %c0 = arith.constant 0 : index
    %c0_0 = arith.constant 0 : index
    %0 = vector.load %arg2[%c0, %c0_0] : memref<8x16xf32, #tpu.memory_space<vmem>>, vector<8x16xf32>
    %c0_1 = arith.constant 0 : index
    %c0_2 = arith.constant 0 : index
    %1 = vector.load %arg1[%c0_1, %c0_2] : memref<8x16xf32, #tpu.memory_space<vmem>>, vector<8x16xf32>
    %cst = arith.constant dense<0.000000e+00> : vector<8x8xf32>
    %2 = tpu.matmul %0, %1, %cst {dimension_numbers = #tpu.dot_dimension_numbers<[1], [1], [0], [0], [0, 0, 1, 0], [], []>} : vector<8x16xf32>, vector<8x16xf32>, vector<8x8xf32> -> vector<8x8xf32>
    %c0_3 = arith.constant 0 : index
    %c0_4 = arith.constant 0 : index
    %3 = vector.load %arg3[%c0_3, %c0_4] : memref<8x1xf32, #tpu.memory_space<vmem>>, vector<8x1xf32>
    %4 = vector.broadcast %3 : vector<8x1xf32> to vector<8x8xf32>
    %5 = arith.addf %2, %4 : vector<8x8xf32>
    %cst_5 = arith.constant 0.000000e+00 : f32
    %6 = vector.broadcast %cst_5 : f32 to vector<8x8xf32>
    %7 = arith.maximumf %5, %6 : vector<8x8xf32>
    %c0_6 = arith.constant 0 : index
    %c0_7 = arith.constant 0 : index
    %8 = vector.load %arg4[%c0_6, %c0_7] : memref<8x1xf32, #tpu.memory_space<vmem>>, vector<8x1xf32>
    %9 = vector.broadcast %8 : vector<8x1xf32> to vector<8x8xf32>
    %10 = arith.mulf %7, %9 : vector<8x8xf32>
    %cst_8 = arith.constant dense<0.000000e+00> : vector<8xf32>
    %11 = vector.multi_reduction <add>, %10, %cst_8 [0] : vector<8x8xf32> to vector<8xf32>
    %12 = vector.shape_cast %11 : vector<8xf32> to vector<1x8xf32>
    %c0_9 = arith.constant 0 : index
    %13 = memref.load %arg5[%c0_9] : memref<1xf32, #tpu.memory_space<smem>>
    %14 = vector.broadcast %13 : f32 to vector<1x8xf32>
    %15 = arith.addf %12, %14 : vector<1x8xf32>
    %16 = arith.negf %15 : vector<1x8xf32>
    %17 = math.exp %16 : vector<1x8xf32>
    %cst_10 = arith.constant 1.000000e+00 : f32
    %18 = vector.broadcast %cst_10 : f32 to vector<1x8xf32>
    %19 = arith.addf %18, %17 : vector<1x8xf32>
    %20 = arith.divf %18, %19 : vector<1x8xf32>
    %c0_11 = arith.constant 0 : index
    %c0_12 = arith.constant 0 : index
    %21 = vector.load %arg6[%c0_11, %c0_12] : memref<1x8xf32, #tpu.memory_space<vmem>>, vector<1x8xf32>
    tpu.vector_store %arg6[%c0_11, %c0_12], %20 {strides = array<i32>} : memref<1x8xf32, #tpu.memory_space<vmem>>, vector<1x8xf32>,
    return
  }
  func.func @transform_0(%arg0: i32) -> (i32, i32) {
    %c0_i32 = arith.constant 0 : i32
    %c0_i32_0 = arith.constant 0 : i32
    return %arg0, %c0_i32 : i32, i32
  }
  func.func @transform_1(%arg0: i32) -> (i32, i32) {
    %c0_i32 = arith.constant 0 : i32
    %c0_i32_0 = arith.constant 0 : i32
    %c0_i32_1 = arith.constant 0 : i32
    return %c0_i32, %c0_i32_0 : i32, i32
  }
  func.func @transform_2(%arg0: i32) -> (i32, i32) {
    %c0_i32 = arith.constant 0 : i32
    %c0_i32_0 = arith.constant 0 : i32
    %c0_i32_1 = arith.constant 0 : i32
    return %c0_i32, %c0_i32_0 : i32, i32
  }
  func.func @transform_3(%arg0: i32) -> (i32, i32) {
    %c0_i32 = arith.constant 0 : i32
    %c0_i32_0 = arith.constant 0 : i32
    %c0_i32_1 = arith.constant 0 : i32
    return %c0_i32, %c0_i32_0 : i32, i32
  }
  func.func @transform_4(%arg0: i32) -> i32 {
    %c0_i32 = arith.constant 0 : i32
    %c0_i32_0 = arith.constant 0 : i32
    return %c0_i32 : i32
  }
  func.func @transform_5(%arg0: i32) -> (i32, i32) {
    %c0_i32 = arith.constant 0 : i32
    %c0_i32_0 = arith.constant 0 : i32
    return %c0_i32, %arg0 : i32, i32
  }
}

</mosaic_0001>

<bundles_post_ra>
// kernel: tpu_custom_call.1
= control target key start
LH: loop header
LB: loop body
LE: loop exit
PB: predicated region body
PF: predicated region fallthrough
CT: control target
= control target key end

     0   :  { %vm30_vm0 = vcmask 130048   ;;  %v191_v1 = vmov 0.0   ;;  %vm192_vm1 = vmmov 0   ;;  %s252_s0 = inlined_call_operand.vmem [shape: f32[8,16], index: 0, kind: input, shape index: {}]   ;;  %s253_s1 = inlined_call_operand.vmem [shape: f32[8,16], index: 1, kind: input, shape index: {}]   ;;  %s254_s2 = inlined_call_operand.vmem [shape: f32[8,1], index: 2, kind: input, shape index: {}]   ;;  %s255_s3 = inlined_call_operand.vmem [shape: f32[8,1], index: 3, kind: input, shape index: {}]   ;;  %s256_s4 = inlined_call_operand.<no memory space> [shape: f32[1], index: 4, kind: input, shape index: {}]   ;;  %s257_s5 = inlined_call_operand.hbm [shape: f32[1,8], index: 5, kind: output, shape index: {}]  }
   0x1   :  { %v23_v0 = vld [vmem:[%s252_s0] sm:$0xff]  ;;  %153 = vmatprep.subr.mxu0 %v191_v1  ;;  %155 = vmatprep.mubr.msk.f32.mxu0 %vm192_vm1, %v191_v1 }
   0x2   :  { %v24_v2 = vld [vmem:[%s254_s2] sm:$0xff] }
   0x3   :  { %11 = vsyncpa [#allocation4], 0  ;;  %154 = vmatpush3.xpose.msk.msra.mxu0 %vm30_vm0, %v23_v0  ;;  %v22_v3 = vld [vmem:[%s253_s1] sm:$0xff]  ;;  %v193_v4 = vmov 0   ;;  %vm115_vm2 = vcmask 64512   ;;  %v124_v19 = vstv %s256_s4  ;;  %vm132_vm3 = vcmask 57344  }
   0x4   :  { %162 = vset.pattern.permute.xlu0 %v193_v4  ;;  %v108_v5 = vld [vmem:[%s255_s3] sm:$0xff]  ;;  %s194_s3 = smov [#allocation3]  }
   0x5   :  { %27 = vperm.xlu0 %162, %v24_v2   ;;  %s140_s25 = sshll.u32 %s194_s3, 4  ;;  %s141_s25 = int_to_ptr.vmem [resolvable:$true] %s140_s25 }
   0x6   :  { %156 = vmatmul.mubr.msk.f32.vlgmr.msra.gmra.mrb[0].mxu0 %vm30_vm0, %v22_v3  ;;  %s167_s26 = scalar_lea.vmem %s141_s25, 16  ;;  %s171_s27 = scalar_lea.vmem %s141_s25, 32 }
   0x7   :  { %p168_p0 = scmp.ne.s32.totalorder %s141_s25, %s167_s26  ;;  %p172_p1 = scmp.lt.s32.totalorder %s141_s25, %s141_s25 }
   0x8   :  { %p173_p2 = scmp.lt.s32.totalorder %s171_s27, %s167_s26 }
   0x9   :  { %111 = vperm.xlu0 %162, %v108_v5  }
   0xa   :  { %p174_p3 = por %p173_p2, %p172_p1 }
   0xc   :  { %p175_p4 = pnand %p174_p3, %p168_p0 }
  0x84   :  { %v28_v6 = vpop.permute.xlu0 %27 }
  0x88   :  { %v112_v11 = vpop.permute.xlu0 %111 }
  0xd9   :  { %v103_v7 = vpop.f32.mrb[0].mxu0 }
  0xda   :  { %v104_v8 = vadd.f32 %v103_v7, %v28_v6  ;;  %v157_v9 = vpop.f32.mrb[1].mxu0 }
  0xdc   :  { %v107_v10 = vmax.f32 %v104_v8, 0.0 }
  0xde   :  { %v114_v12 = vmul.f32 %v112_v11, %v107_v10 }
  0xe0   :  { %v116_v13 = vsel %vm115_vm2, %v114_v12, 0.0 }
  0xe1   :  { %v117_v14 = vrot.slane %v116_v13, 4 }
  0xe3   :  { %v118_v15 = vadd.f32 %v117_v14, %v116_v13 }
  0xe5   :  { %v119_v16 = vrot.slane %v118_v15, 2 }
  0xe7   :  { %v120_v17 = vadd.f32 %v119_v16, %v118_v15 }
  0xe9   :  { %v121_v18 = vrot.slane %v120_v17, 1 }
  0xeb   :  { %v122_v20 = vadd.f32 %v121_v18, %v120_v17 }
  0xed   :  { %v125_v21 = vadd.f32 %v124_v19, %v122_v20 }
  0xef   :  { %v150_v22 = vmul.f32 -1.442695, %v125_v21 }
  0xf1   :  { %163 = vpow2.f32 %v150_v22 }
  0xfb   :  { %v164_v23 = vpop.eup %163 }
  0xfc   :  { %v129_v24 = vadd.f32 1.0, %v164_v23 }
  0xfe   :  { %165 = vrcp.f32 %v129_v24 }
 0x108   :  { %v166_v25 = vpop.eup %165 }
 0x109   :  { %133 = vst.msk [vmem:[#allocation3] sm:$0x1] %vm132_vm3, %v166_v25 }
 0x10a   :  { %178 = shalt.err (!%p175_p4)
}
 0x10b   :  { %s179_s29 = scalar_lea.hbm %s257_s5, 16 }
 0x10c   :  { %p180_p5 = scmp.ne.s32.totalorder %s257_s5, %s179_s29  ;;  %p183_p6 = scmp.lt.u32.totalorder %s179_s29, %s257_s5 }
 0x10e   :  { %p185_p7 = pnand %p183_p6, %p180_p5 }
 0x110   :  { %188 = shalt.err (!%p185_p7)
}
 0x111   :  { %143 = dma.vmem_to_hbm [thread:$0]  %s141_s25, 16, %s257_s5, [#allocation4]  }
 0x112   :  { %189 = dma.done.wait [#allocation4], 16  }
 0x113   :  { %190 = vsyncadd [#allocation4], 4294967280 }
 0x114   :  { %147 = vsyncpa [#allocation4], 1 }

</bundles_post_ra>
